<compile_context>
chip_gen: v7x
topology: tpu7x:2x2x1
jax: 0.10.0
libtpu: 0.0.40
codegen_flags: <defaults>
</compile_context>

<pallas_src>
import jax
import jax.numpy as jnp
from jax.experimental import pallas as pl
from jax.experimental.pallas import tpu as pltpu

Z_DIM = 64
HIDDEN = 256
IMG_DIM = 784          # 28 * 28 (MNIST)


def _round_up(x, m):
    return (x + m - 1) // m * m


def _generator_kernel(x_ref, w1_ref, b1_ref, w2_ref, b2_ref, o_ref):
    # Layer 1: Linear(z_dim -> 256). x and w1 are bf16, f32 accumulate on MXU.
    h = jnp.dot(x_ref[...], w1_ref[...], preferred_element_type=jnp.float32)
    h = h + b1_ref[...]                       # (1, HIDDEN) broadcasts over batch
    # LeakyReLU(negative_slope=0.01) in f32 on the VPU.
    h = jnp.where(h >= 0.0, h, 0.01 * h)
    # Layer 2: Linear(256 -> 784). bf16 MXU, f32 accumulate, f32 bias add.
    y = jnp.dot(h.astype(jnp.bfloat16), w2_ref[...],
                preferred_element_type=jnp.float32)
    y = y + b2_ref[...]
    # Tanh at the output dtype (bf16 by default -> bf16 EUP on v6e/v7x),
    # stored directly: lane-masked only on the final 16 lanes of 784.
    o_ref[...] = jnp.tanh(y.astype(o_ref.dtype))


def prepare_params(w1, b1, w2, b2):
    """One-time parameter prep (do NOT redo per forward call).
    Weights are pre-transposed (in, out); cast to bf16 for the MXU, biases kept
    f32 and reshaped to (1, out) so the kernel bias add is a pure broadcast."""
    w1_bf = w1.astype(jnp.bfloat16)                       # (Z_DIM, HIDDEN)
    w2_bf = w2.astype(jnp.bfloat16)                       # (HIDDEN, IMG_DIM)
    b1_2d = b1.reshape(1, HIDDEN).astype(jnp.float32)
    b2_2d = b2.reshape(1, IMG_DIM).astype(jnp.float32)
    return w1_bf, b1_2d, w2_bf, b2_2d


def generator_forward(x, w1_bf, b1_2d, w2_bf, b2_2d, *,
                      block_b=1024, out_dtype=jnp.bfloat16):
    """x: (B, Z_DIM) float. Params as produced by prepare_params().
    Returns (B, IMG_DIM) in out_dtype (bf16 by default; upcast in the consumer
    if f32 is required)."""
    B = x.shape[0]

    # Batch tile: multiple of 8 (sublane). Default 1024 keeps resident weights
    # + 2x double-buffered (x, out) tiles + f32 temps at ~9 MB — inside the
    # 32 MiB scoped-VMEM default on v5e/v6e/v7x.
    TB = min(block_b, _round_up(B, 8))
    Bp = _round_up(B, TB)
    # Guarantee >= 2 grid steps when the batch allows it so the "parallel"
    # batch axis actually shards across v7x's 2 TensorCores.
    if Bp // TB < 2 and Bp >= 16:
        TB = _round_up(pl.cdiv(Bp, 2), 8)
        Bp = _round_up(B, TB)
    grid = (Bp // TB,)

    # Cast x to bf16 once (halves the x DMA); pad the batch only if needed.
    x_bf = x.astype(jnp.bfloat16)
    if Bp != B:
        x_bf = jnp.zeros((Bp, Z_DIM), jnp.bfloat16).at[:B].set(x_bf)

    out_itemsize = jnp.dtype(out_dtype).itemsize
    flops = 2 * Bp * (Z_DIM * HIDDEN + HIDDEN * IMG_DIM)
    bytes_accessed = (Bp * Z_DIM * 2                       # x (bf16)
                      + w1_bf.size * 2 + w2_bf.size * 2    # weights (bf16), once
                      + b1_2d.size * 4 + b2_2d.size * 4    # biases (f32), once
                      + Bp * IMG_DIM * out_itemsize)       # output

    out = pl.pallas_call(
        _generator_kernel,
        out_shape=jax.ShapeDtypeStruct((Bp, IMG_DIM), out_dtype),
        grid_spec=pl.GridSpec(
            grid=grid,
            in_specs=[
                # Activations: tiled over the batch grid (double-buffered).
                pl.BlockSpec((TB, Z_DIM), lambda i: (i, 0)),
                # Weights/biases: constant index_map -> DMA'd once, resident.
                pl.BlockSpec((Z_DIM, HIDDEN), lambda i: (0, 0)),
                pl.BlockSpec((1, HIDDEN), lambda i: (0, 0)),
                pl.BlockSpec((HIDDEN, IMG_DIM), lambda i: (0, 0)),
                pl.BlockSpec((1, IMG_DIM), lambda i: (0, 0)),
            ],
            # Last block dim (784) equals the full array dim -> legal unpadded
            # output; no wrapper slice copy.
            out_specs=pl.BlockSpec((TB, IMG_DIM), lambda i: (i, 0)),
        ),
        compiler_params=pltpu.CompilerParams(
            # Independent batch tiles -> shard across TensorCores on v7x.
            dimension_semantics=("parallel",),
        ),
        cost_estimate=pl.CostEstimate(
            flops=flops,
            transcendentals=Bp * IMG_DIM,     # tanh
            bytes_accessed=bytes_accessed,
        ),
    )(x_bf, w1_bf, b1_2d, w2_bf, b2_2d)

    return out if Bp == B else out[:B]


def init_params(key):
    """Deterministic init mimicking nn.Linear default (uniform +-1/sqrt(fan_in)).
    Weights stored pre-transposed as (in, out), in f32."""
    k1, k2, k3, k4 = jax.random.split(key, 4)
    lim1 = 1.0 / jnp.sqrt(Z_DIM)
    lim2 = 1.0 / jnp.sqrt(HIDDEN)
    w1 = jax.random.uniform(k1, (Z_DIM, HIDDEN), jnp.float32, -lim1, lim1)
    b1 = jax.random.uniform(k2, (HIDDEN,), jnp.float32, -lim1, lim1)
    w2 = jax.random.uniform(k3, (HIDDEN, IMG_DIM), jnp.float32, -lim2, lim2)
    b2 = jax.random.uniform(k4, (IMG_DIM,), jnp.float32, -lim2, lim2)
    return w1, b1, w2, b2


if __name__ == "__main__":
    key = jax.random.PRNGKey(0)
    k_x, k_p = jax.random.split(key)
    # Small batch: with the default block_b, the grid>=2 rule kicks in
    # (TB=24 -> 2 grid steps) and no batch padding/slice is needed (48 % 24 == 0).
    B = 48
    x = jax.random.normal(k_x, (B, Z_DIM), jnp.float32)
    w1, b1, w2, b2 = init_params(k_p)
    w1_bf, b1_2d, w2_bf, b2_2d = prepare_params(w1, b1, w2, b2)

    out = generator_forward(x, w1_bf, b1_2d, w2_bf, b2_2d)
    out = jax.block_until_ready(out)

    # Pure-JAX f32 reference (kernel uses bf16 weights/activations and a bf16
    # output -> looser tolerance).
    ref_h = x @ w1 + b1
    ref_h = jnp.where(ref_h >= 0.0, ref_h, 0.01 * ref_h)
    ref = jnp.tanh(ref_h @ w2 + b2)
    assert out.shape == (B, IMG_DIM)
    max_err = float(jnp.max(jnp.abs(out.astype(jnp.float32) - ref)))
    assert max_err < 3e-2, f"max abs err {max_err}"

    print("KERNEL_OK")
</pallas_src>

<mosaic_0001>
module attributes {stable_mosaic.version = 11 : i64} {
  func.func @_generator_kernel(%arg0: i32, %arg1: memref<24x64xbf16, #tpu.memory_space<vmem>>, %arg2: memref<64x256xbf16, #tpu.memory_space<vmem>>, %arg3: memref<1x256xf32, #tpu.memory_space<vmem>>, %arg4: memref<256x784xbf16, #tpu.memory_space<vmem>>, %arg5: memref<1x784xf32, #tpu.memory_space<vmem>>, %arg6: memref<24x784xbf16, #tpu.memory_space<vmem>>) attributes {dimension_semantics = [#tpu.dimension_semantics<parallel>], iteration_bounds = array<i64: 2>, scalar_prefetch = 0 : i64, scratch_operands = 0 : i64, tpu.core_type = #tpu.core_type<tc>, window_params = [{transform_indices = @transform_0, window_bounds = array<i64: 24, 64>}, {pipeline_mode = #tpu.pipeline_mode<synchronous>, transform_indices = @transform_1, window_bounds = array<i64: 64, 256>}, {pipeline_mode = #tpu.pipeline_mode<synchronous>, transform_indices = @transform_2, window_bounds = array<i64: 1, 256>}, {pipeline_mode = #tpu.pipeline_mode<synchronous>, transform_indices = @transform_3, window_bounds = array<i64: 256, 784>}, {pipeline_mode = #tpu.pipeline_mode<synchronous>, transform_indices = @transform_4, window_bounds = array<i64: 1, 784>}, {transform_indices = @transform_5, window_bounds = array<i64: 24, 784>}]} {
    %c0 = arith.constant 0 : index
    %c0_0 = arith.constant 0 : index
    %0 = vector.load %arg1[%c0, %c0_0] : memref<24x64xbf16, #tpu.memory_space<vmem>>, vector<24x64xbf16>
    %c0_1 = arith.constant 0 : index
    %c0_2 = arith.constant 0 : index
    %1 = vector.load %arg2[%c0_1, %c0_2] : memref<64x256xbf16, #tpu.memory_space<vmem>>, vector<64x256xbf16>
    %cst = arith.constant dense<0.000000e+00> : vector<24x256xf32>
    %2 = tpu.matmul %0, %1, %cst {dimension_numbers = #tpu.dot_dimension_numbers<[1], [0], [0], [1], [0, 0, 1, 1], [], []>} : vector<24x64xbf16>, vector<64x256xbf16>, vector<24x256xf32> -> vector<24x256xf32>
    %c0_3 = arith.constant 0 : index
    %c0_4 = arith.constant 0 : index
    %3 = vector.load %arg3[%c0_3, %c0_4] : memref<1x256xf32, #tpu.memory_space<vmem>>, vector<1x256xf32>
    %4 = vector.broadcast %3 : vector<1x256xf32> to vector<24x256xf32>
    %5 = arith.addf %2, %4 : vector<24x256xf32>
    %cst_5 = arith.constant 0.000000e+00 : f32
    %6 = vector.broadcast %cst_5 : f32 to vector<24x256xf32>
    %7 = arith.cmpf oge, %5, %6 : vector<24x256xf32>
    %cst_6 = arith.constant 0.00999999977 : f32
    %8 = vector.broadcast %cst_6 : f32 to vector<24x256xf32>
    %9 = arith.mulf %8, %5 : vector<24x256xf32>
    %10 = arith.select %7, %5, %9 : vector<24x256xi1>, vector<24x256xf32>
    %11 = arith.truncf %10 : vector<24x256xf32> to vector<24x256xbf16>
    %c0_7 = arith.constant 0 : index
    %c0_8 = arith.constant 0 : index
    %12 = vector.load %arg4[%c0_7, %c0_8] : memref<256x784xbf16, #tpu.memory_space<vmem>>, vector<256x784xbf16>
    %cst_9 = arith.constant dense<0.000000e+00> : vector<24x784xf32>
    %13 = tpu.matmul %11, %12, %cst_9 {dimension_numbers = #tpu.dot_dimension_numbers<[1], [0], [0], [1], [0, 0, 1, 1], [], []>} : vector<24x256xbf16>, vector<256x784xbf16>, vector<24x784xf32> -> vector<24x784xf32>
    %c0_10 = arith.constant 0 : index
    %c0_11 = arith.constant 0 : index
    %14 = vector.load %arg5[%c0_10, %c0_11] : memref<1x784xf32, #tpu.memory_space<vmem>>, vector<1x784xf32>
    %15 = vector.broadcast %14 : vector<1x784xf32> to vector<24x784xf32>
    %16 = arith.addf %13, %15 : vector<24x784xf32>
    %17 = arith.truncf %16 : vector<24x784xf32> to vector<24x784xbf16>
    %18 = math.tanh %17 : vector<24x784xbf16>
    %c0_12 = arith.constant 0 : index
    %c0_13 = arith.constant 0 : index
    %19 = vector.load %arg6[%c0_12, %c0_13] : memref<24x784xbf16, #tpu.memory_space<vmem>>, vector<24x784xbf16>
    tpu.vector_store %arg6[%c0_12, %c0_13], %18 {strides = array<i32>} : memref<24x784xbf16, #tpu.memory_space<vmem>>, vector<24x784xbf16>,
    return
  }
  func.func @transform_0(%arg0: i32) -> (i32, i32) {
    %c0_i32 = arith.constant 0 : i32
    %c0_i32_0 = arith.constant 0 : i32
    return %arg0, %c0_i32 : i32, i32
  }
  func.func @transform_1(%arg0: i32) -> (i32, i32) {
    %c0_i32 = arith.constant 0 : i32
    %c0_i32_0 = arith.constant 0 : i32
    %c0_i32_1 = arith.constant 0 : i32
    return %c0_i32, %c0_i32_0 : i32, i32
  }
  func.func @transform_2(%arg0: i32) -> (i32, i32) {
    %c0_i32 = arith.constant 0 : i32
    %c0_i32_0 = arith.constant 0 : i32
    %c0_i32_1 = arith.constant 0 : i32
    return %c0_i32, %c0_i32_0 : i32, i32
  }
  func.func @transform_3(%arg0: i32) -> (i32, i32) {
    %c0_i32 = arith.constant 0 : i32
    %c0_i32_0 = arith.constant 0 : i32
    %c0_i32_1 = arith.constant 0 : i32
    return %c0_i32, %c0_i32_0 : i32, i32
  }
  func.func @transform_4(%arg0: i32) -> (i32, i32) {
    %c0_i32 = arith.constant 0 : i32
    %c0_i32_0 = arith.constant 0 : i32
    %c0_i32_1 = arith.constant 0 : i32
    return %c0_i32, %c0_i32_0 : i32, i32
  }
  func.func @transform_5(%arg0: i32) -> (i32, i32) {
    %c0_i32 = arith.constant 0 : i32
    %c0_i32_0 = arith.constant 0 : i32
    return %arg0, %c0_i32 : i32, i32
  }
}

</mosaic_0001>

<bundles_post_ra>
// kernel: tpu_custom_call.1
= control target key start
LH: loop header
LB: loop body
LE: loop exit
PB: predicated region body
PF: predicated region fallthrough
CT: control target
= control target key end

     0   :  { %10 = vsyncpa [#allocation3], 0  ;;  %s2551_s0 = inlined_call_operand.vmem [shape: bf16[48,64], index: 0, kind: input, shape index: {}]   ;;  %s2552_s1 = inlined_call_operand.vmem [shape: bf16[64,256], index: 1, kind: input, shape index: {}]   ;;  %s2553_s2 = inlined_call_operand.vmem [shape: f32[1,256], index: 2, kind: input, shape index: {}]   ;;  %s2554_s3 = inlined_call_operand.vmem [shape: bf16[256,784], index: 3, kind: input, shape index: {}]   ;;  %s2555_s4 = inlined_call_operand.vmem [shape: f32[1,784], index: 4, kind: input, shape index: {}]   ;;  %s2556_s5 = inlined_call_operand.hbm [shape: bf16[48,784], index: 5, kind: output, shape index: {}]  }
   0x1   :  { %12 = vsyncpa [#allocation3 + $0x1], 0  ;;  %s2014_s18 = smov 0   ;;  %s2016_s19 = smov 0  }
   0x2   :  { %s2018_s20 = smov 0   ;;  %s2020_s21 = smov 0  }
   0x3 LB: > { %s2035_s22 = sadd.s32 4294967295, %s1978_s21   ;;  %s1497_s23 = sadd.s32 4294967294, %s1978_s21   ;;  %s1978_s21 = sphi %s2020_s21, %s2562_s21   ;;  %s1974_s20 = sphi %s2018_s20, %s2561_s20   ;;  %s1970_s19 = sphi %s2016_s19, %s2560_s19   ;;  %s1966_s18 = sphi %s2014_s18, %s2559_s18  }
   0x4   : > { %s2039_s24 = sadd.s32 1, %s1978_s21   ;;  %s135_s25 = sadd.s32 1, %s1974_s20 }
   0x5   : > { %s132_s26 = ssub.s32 %s1978_s21, %s2039_s24  ;;  %p145_p0 = scmp.ne.s32.totalorder %s1974_s20, %s1970_s19 }
   0x6   : > { %p133_p1 = scmp.eq.s32.totalorder %s132_s26, 0  ;;  %p146_p2 = scmp.eq.s32.totalorder %s2035_s22, 1 }
   0x7   : > { %p151_p3 = scmp.ne.s32.totalorder %s1970_s19, %s1966_s18  ;;  %p152_p4 = scmp.eq.s32.totalorder %s1497_s23, 1 }
   0x8   : > { %s2050_s27 = scalar_select %p133_p1, %s1974_s20, %s135_s25  }
   0x9   : > { %p2052_p5 = por %p146_p2, %p145_p0  ;;  %p2056_p6 = por %p152_p4, %p151_p3 }
   0xa   : > { %p1500_p7 = scmp.ge.s32.totalorder %s1978_s21, 1  ;;  %p191_p8 = scmp.lt.s32.totalorder %s1978_s21, 3 }
   0xc   : > { %p192_p9 = pnand %p1500_p7, %p191_p8 }
   0xd   : > { %v1714_v0 = vld [vmem:[%s2552_s1 + $0x4] ss:$8 sps:$4 sm:$0xff] (!%p192_p9)   ;;  %s219_s7 = smul.u32 (!%p192_p9), 3, %s2035_s22  ;;  %v1716_v1 = vld [vmem:[%s2552_s1] ss:$8 sps:$4 sm:$0xff] (!%p192_p9)   ;;  %v1980_v2 = vmov (!%p192_p9), 0  }
   0xe   : > { %195 = sbr.rel (%p192_p9) target bundleno = 571 (0x23b), region = 40  ;;  %337 = vmatprep.mubr.bf16.mxu0 (!%p192_p9), %v1980_v2  ;;  %305 = vmatprep.subr.bf16.mxu0 (!%p192_p9), %v1714_v0  ;;  %v1717_v3 = vld [vmem:[%s2552_s1 + $0x14] ss:$8 sps:$4 sm:$0xff] (!%p192_p9)   ;;  %v1719_v4 = vld [vmem:[%s2552_s1 + $0x10] ss:$8 sps:$4 sm:$0xff] (!%p192_p9)   ;;  %vm298_vm0 = vcmask (!%p192_p9), 523264  }
   0xf   : > { %p220_p10 = scmp.lt.s32.totalorder (!%p192_p9), %s219_s7, 5  ;;  %306 = vmatpush1.bf16.msra.mxu0 (!%p192_p9), %v1716_v1  ;;  %v1720_v5 = vld [vmem:[%s2552_s1 + $0x24] ss:$8 sps:$4 sm:$0xff] (!%p192_p9)   ;;  %v1722_v7 = vld [vmem:[%s2552_s1 + $0x20] ss:$8 sps:$4 sm:$0xff] (!%p192_p9)   ;;  %vm1410_vm7 = vcmask (!%p192_p9), 125952  }
  0x10   : > { %307 = vmatprep.subr.bf16.mxu0 (!%p192_p9), %v1717_v3  ;;  %v1728_v6 = vld [vmem:[%s2554_s3 + $0x4] ss:$28 sps:$4 sm:$0xff] (!%p192_p9)   ;;  %v1723_v9 = vld [vmem:[%s2552_s1 + $0x34] ss:$8 sps:$4 sm:$0xff] (!%p192_p9)   ;;  %v1725_v11 = vld [vmem:[%s2552_s1 + $0x30] ss:$8 sps:$4 sm:$0xff] (!%p192_p9)  }
  0x11   : > { %v1733_v8 = vld [vmem:[%s2554_s3] ss:$28 sps:$4 sm:$0xff] (!%p192_p9)   ;;  %1119 = vmatprep.subr.bf16.mxu1 (!%p192_p9), %v1728_v6  ;;  %v1732_v12 = vld [vmem:[%s2554_s3 + $0xc] ss:$28 sps:$4 sm:$0xff] (!%p192_p9)   ;;  %v1739_v13 = vld [vmem:[%s2554_s3 + $0x38] ss:$28 sps:$4 sm:$0xff] (!%p192_p9)  }
  0x12   : > { %1120 = vmatpush1.bf16.msra.mxu1 (!%p192_p9), %v1733_v8  ;;  %v1734_v10 = vld [vmem:[%s2554_s3 + $0x3c] ss:$28 sps:$4 sm:$0xff] (!%p192_p9)   ;;  %v1740_v14 = vld [vmem:[%s2554_s3 + $0x74] ss:$28 sps:$4 sm:$0xff] (!%p192_p9)   ;;  %v1730_v16 = vld [vmem:[%s2554_s3 + $0x8] ss:$28 sps:$4 sm:$0xff] (!%p192_p9)  }
  0x13   : > { %308 = vmatpush1.bf16.msra.mxu0 (!%p192_p9), %v1719_v4  ;;  %1121 = vmatprep.subr.bf16.mxu1 (!%p192_p9), %v1734_v10  ;;  %v1745_v17 = vld [vmem:[%s2554_s3 + $0x70] ss:$28 sps:$4 sm:$0xff] (!%p192_p9)   ;;  %v1738_v18 = vld [vmem:[%s2554_s3 + $0x44] ss:$28 sps:$4 sm:$0xff] (!%p192_p9)   ;;  %v1744_v23 = vld [vmem:[%s2554_s3 + $0x7c] ss:$28 sps:$4 sm:$0xff] (!%p192_p9)  }
  0x14   : > { %309 = vmatprep.subr.bf16.mxu0 (!%p192_p9), %v1720_v5  ;;  %v1746_v19 = vld [vmem:[%s2554_s3 + $0xac] ss:$28 sps:$4 sm:$0xff] (!%p192_p9)   ;;  %v1736_v21 = vld [vmem:[%s2554_s3 + $0x40] ss:$28 sps:$4 sm:$0xff] (!%p192_p9)   ;;  %v1742_v25 = vld [vmem:[%s2554_s3 + $0x78] ss:$28 sps:$4 sm:$0xff] (!%p192_p9)  }
  0x15   : > { %s2564_s7 = smov (!%p220_p10, %s219_s7), 5  ;;  %v1751_v20 = vld [vmem:[%s2554_s3 + $0xa8] ss:$28 sps:$4 sm:$0xff]   ;;  %v1757_v26 = vld [vmem:[%s2554_s3 + $0xe0] ss:$28 sps:$4 sm:$0xff]   ;;  %s1677_s23 = smul.u32 1344, %s2035_s22 }
  0x16   : > { %s1501_s16 = sshll.u32 %s2564_s7, 2  ;;  %1122 = vmatpush1.bf16.msra.mxu1 %v1739_v13  ;;  %v1752_v22 = vld [vmem:[%s2554_s3 + $0xe4] ss:$28 sps:$4 sm:$0xff]   ;;  %v1758_v27 = vld [vmem:[%s2554_s3 + $0x11c] ss:$28 sps:$4 sm:$0xff]   ;;  %v240_v13 = vlaneseq  ;;  %s1981_s10 = smov [#allocation2]  }
  0x17   : > { %s2087_s8 = scalar_lea.vmem %s2551_s0, %s1501_s16  ;;  %310 = vmatpush1.bf16.msra.mxu0 %v1722_v7  ;;  %1123 = vmatprep.subr.bf16.mxu1 %v1740_v14  ;;  %v1750_v28 = vld [vmem:[%s2554_s3 + $0xb4] ss:$28 sps:$4 sm:$0xff]   ;;  %v1756_v32 = vld [vmem:[%s2554_s3 + $0xec] ss:$28 sps:$4 sm:$0xff]   ;;  %v1762_v36 = vld [vmem:[%s2554_s3 + $0x124] ss:$28 sps:$4 sm:$0xff]   ;;  %s2503_s6 = scalar_lea.hbm %s2556_s5, %s1677_s23 }
  0x18   : > { %311 = vmatprep.subr.bf16.mxu0 %v1723_v9  ;;  %v1726_v15 = vld [vmem:[%s2087_s8] sm:$0xff]   ;;  %v1727_v24 = vld [vmem:[%s2087_s8 + $0x8] ss:$0 sps:$4 sm:$0xff]   ;;  %v1763_v29 = vld [vmem:[%s2554_s3 + $0x118] ss:$28 sps:$4 sm:$0xff]   ;;  %v2294_v14 = vshrl.u32 %v240_v13, 7 }
  0x19   : > { %v1748_v30 = vld [vmem:[%s2554_s3 + $0xb0] ss:$28 sps:$4 sm:$0xff]   ;;  %v1754_v33 = vld [vmem:[%s2554_s3 + $0xe8] ss:$28 sps:$4 sm:$0xff]   ;;  %v1760_v38 = vld [vmem:[%s2554_s3 + $0x120] ss:$28 sps:$4 sm:$0xff]  }
  0x1a   : > { %1124 = vmatpush1.bf16.msra.mxu1 %v1745_v17  ;;  %v1764_v31 = vld [vmem:[%s2554_s3 + $0x154] ss:$28 sps:$4 sm:$0xff]   ;;  %v1770_v35 = vld [vmem:[%s2554_s3 + $0x18c] ss:$28 sps:$4 sm:$0xff]   ;;  %v1776_v39 = vld [vmem:[%s2554_s3 + $0x1c4] ss:$28 sps:$4 sm:$0xff]  }
  0x1b   : > { %312 = vmatpush1.bf16.msra.mxu0 %v1725_v11  ;;  %1125 = vmatprep.subr.bf16.mxu1 %v1746_v19  ;;  %v1769_v34 = vld [vmem:[%s2554_s3 + $0x150] ss:$28 sps:$4 sm:$0xff]   ;;  %v1775_v37 = vld [vmem:[%s2554_s3 + $0x188] ss:$28 sps:$4 sm:$0xff]   ;;  %v1768_v40 = vld [vmem:[%s2554_s3 + $0x15c] ss:$28 sps:$4 sm:$0xff]  }
  0x1c   : > { %1170 = vmatprep.subr.bf16.mxu0 %v1732_v12  ;;  %v1766_v41 = vld [vmem:[%s2554_s3 + $0x158] ss:$28 sps:$4 sm:$0xff]   ;;  %v1781_v42 = vld [vmem:[%s2554_s3 + $0x1c0] ss:$28 sps:$4 sm:$0xff]   ;;  %v1772_v45 = vld [vmem:[%s2554_s3 + $0x190] ss:$28 sps:$4 sm:$0xff]  }
  0x1d   : > { %v1782_v43 = vld [vmem:[%s2554_s3 + $0x1fc] ss:$28 sps:$4 sm:$0xff]   ;;  %v1774_v44 = vld [vmem:[%s2554_s3 + $0x194] ss:$28 sps:$4 sm:$0xff]   ;;  %v1780_v47 = vld [vmem:[%s2554_s3 + $0x1cc] ss:$28 sps:$4 sm:$0xff]  }
  0x1e   : > { %1512 = vmatmul.mubr.msk.bf16.vlgmr.msra.gmra.mrb[0].mxu0 %vm298_vm0, %v1726_v15  ;;  %1126 = vmatpush1.bf16.msra.mxu1 %v1751_v20  ;;  %v1787_v46 = vld [vmem:[%s2554_s3 + $0x1f8] ss:$28 sps:$4 sm:$0xff]   ;;  %v1793_v49 = vld [vmem:[%s2554_s3 + $0x230] ss:$28 sps:$4 sm:$0xff]   ;;  %v1778_v50 = vld [vmem:[%s2554_s3 + $0x1c8] ss:$28 sps:$4 sm:$0xff]  }
  0x1f   : > { %347 = vmatprep.mubr.bf16.mxu0 %v1980_v2  ;;  %1171 = vmatpush1.bf16.msra.mxu0 %v1730_v16  ;;  %v1788_v48 = vld [vmem:[%s2554_s3 + $0x234] ss:$28 sps:$4 sm:$0xff]   ;;  %v1794_v51 = vld [vmem:[%s2554_s3 + $0x26c] ss:$28 sps:$4 sm:$0xff]   ;;  %v1786_v52 = vld [vmem:[%s2554_s3 + $0x204] ss:$28 sps:$4 sm:$0xff]  }
  0x20   : > { %1172 = vmatprep.subr.bf16.mxu0 %v1738_v18  ;;  %1127 = vmatprep.subr.bf16.mxu1 %v1752_v22  ;;  %v1799_v53 = vld [vmem:[%s2554_s3 + $0x268] ss:$28 sps:$4 sm:$0xff]   ;;  %v1784_v54 = vld [vmem:[%s2554_s3 + $0x200] ss:$28 sps:$4 sm:$0xff]   ;;  %v1790_v58 = vld [vmem:[%s2554_s3 + $0x238] ss:$28 sps:$4 sm:$0xff]  }
  0x21   : > { %v1800_v55 = vld [vmem:[%s2554_s3 + $0x2a4] ss:$28 sps:$4 sm:$0xff]   ;;  %v1792_v56 = vld [vmem:[%s2554_s3 + $0x23c] ss:$28 sps:$4 sm:$0xff]   ;;  %v1798_v60 = vld [vmem:[%s2554_s3 + $0x274] ss:$28 sps:$4 sm:$0xff]  }
  0x22   : > { %1128 = vmatpush1.bf16.msra.mxu1 %v1757_v26  ;;  %v1805_v57 = vld [vmem:[%s2554_s3 + $0x2a0] ss:$28 sps:$4 sm:$0xff]   ;;  %v1796_v61 = vld [vmem:[%s2554_s3 + $0x270] ss:$28 sps:$4 sm:$0xff]   ;;  %v1802_v63 = vld [vmem:[%s2554_s3 + $0x2a8] ss:$28 sps:$4 sm:$0xff]  }
  0x23   : > { %1173 = vmatpush1.bf16.msra.mxu0 %v1736_v21  ;;  %1129 = vmatprep.subr.bf16.mxu1 %v1758_v27  ;;  %v1806_v59 = vld [vmem:[%s2554_s3 + $0x2dc] ss:$28 sps:$4 sm:$0xff]   ;;  %v1804_v62 = vld [vmem:[%s2554_s3 + $0x2ac] ss:$28 sps:$4 sm:$0xff]   ;;  %v1810_v0 = vld [vmem:[%s2554_s3 + $0x2e4] ss:$28 sps:$4 sm:$0xff]  }
  0x24   : > { %1174 = vmatprep.subr.bf16.mxu0 %v1744_v23  ;;  %v1808_v1 = vld [vmem:[%s2554_s3 + $0x2e0] ss:$28 sps:$4 sm:$0xff]   ;;  %v1811_v2 = vld [vmem:[%s2554_s3 + $0x2d8] ss:$28 sps:$4 sm:$0xff]   ;;  %v1817_v6 = vld [vmem:[%s2554_s3 + $0x310] ss:$28 sps:$4 sm:$0xff]  }
  0x25   : > { %v1812_v3 = vld [vmem:[%s2554_s3 + $0x314] ss:$28 sps:$4 sm:$0xff]   ;;  %v1816_v4 = vld [vmem:[%s2554_s3 + $0x31c] ss:$28 sps:$4 sm:$0xff]   ;;  %v1818_v7 = vld [vmem:[%s2554_s3 + $0x34c] ss:$28 sps:$4 sm:$0xff]  }
  0x26   : > { %1513 = vmatmul.mubr.msk.bf16.gmra.mrb[4].mxu0 %vm298_vm0, %v1727_v24  ;;  %1130 = vmatpush1.bf16.msra.mxu1 %v1763_v29  ;;  %v1814_v5 = vld [vmem:[%s2554_s3 + $0x318] ss:$28 sps:$4 sm:$0xff]   ;;  %v1820_v9 = vld [vmem:[%s2554_s3 + $0x350] ss:$28 sps:$4 sm:$0xff]   ;;  %v1823_v10 = vld [vmem:[%s2554_s3 + $0x348] ss:$28 sps:$4 sm:$0xff]  }
  0x27   : > { %1175 = vmatpush1.bf16.msra.mxu0 %v1742_v25  ;;  %1131 = vmatprep.subr.bf16.mxu1 %v1764_v31  ;;  %v1822_v8 = vld [vmem:[%s2554_s3 + $0x354] ss:$28 sps:$4 sm:$0xff]   ;;  %v242_v15 = vsub.s32 0, %v2294_v14  ;;  %v238_v16 = vld [vmem:[%s2553_s2] sm:$0x3]  ;;  %v246_v17 = vsub.s32 1, %v2294_v14 }
  0x28   : > { %1176 = vmatprep.subr.bf16.mxu0 %v1750_v28  ;;  %v1826_v11 = vld [vmem:[%s2554_s3 + $0x14] ss:$28 sps:$4 sm:$0xff]   ;;  %v1862_v13 = vld [vmem:[%s2554_s3 + $0x360] ss:$28 sps:$4 sm:$0xff]   ;;  %s216_s8 = sand.u32 1, %s1970_s19   ;;  %s1920_s7 = sshll.u32 %s1981_s10, 4  ;;  %s1921_s7 = int_to_ptr.vmem [resolvable:$false] %s1920_s7 }
  0x29   : > { %v1827_v12 = vld [vmem:[%s2554_s3 + $0x1d8] ss:$28 sps:$4 sm:$0xff]   ;;  %v243_v18 = vrot.slane %v238_v16, %v242_v15  ;;  %v247_v19 = vrot.slane %v238_v16, %v246_v17  ;;  %s1669_s16 = smul.u32 84, %s216_s8  ;;  %s2510_s9 = scalar_lea.sflag [#allocation3], %s216_s8 }
  0x2a   : > { %1132 = vmatpush1.bf16.msra.mxu1 %v1769_v34  ;;  %v1859_v16 = vld [vmem:[%s2554_s3 + $0x198] ss:$28 sps:$4 sm:$0xff]   ;;  %s1922_s11 = scalar_lea.vmem %s1921_s7, 2688 }
  0x2b   : > { %1177 = vmatpush1.bf16.msra.mxu0 %v1748_v30  ;;  %1133 = vmatprep.subr.bf16.mxu1 %v1770_v35  ;;  %s2479_s17 = scalar_lea.vmem [#allocation2], %s1669_s16 }
  0x2c   : > { %1178 = vmatprep.subr.bf16.mxu0 %v1756_v32  ;;  %s1435_s25 = sshll.u32 %s2479_s17, 4  ;;  %s2505_s25 = int_to_ptr.vmem [resolvable:$true] %s1435_s25 }
  0x2d   : > { %s1916_s22 = scalar_lea.vmem %s2505_s25, 1344  ;;  %p1923_p0 = scmp.lt.s32.totalorder %s2505_s25, %s1921_s7 }
  0x2e   : > { %1134 = vmatpush1.bf16.msra.mxu1 %v1775_v37  ;;  %p1917_p11 = scmp.ne.s32.totalorder %s2505_s25, %s1916_s22  ;;  %p1924_p1 = scmp.lt.s32.totalorder %s1922_s11, %s1916_s22 }
  0x2f   : > { %1179 = vmatpush1.bf16.msra.mxu0 %v1754_v33  ;;  %1135 = vmatprep.subr.bf16.mxu1 %v1776_v39 }
  0x30   : > { %1180 = vmatprep.subr.bf16.mxu0 %v1762_v36  ;;  %p1918_p12 = pnand %p1917_p11, %p2052_p5  ;;  %p1925_p2 = por %p1924_p1, %p1923_p0 }
  0x32   : > { %1136 = vmatpush1.bf16.msra.mxu1 %v1781_v42  ;;  %v1828_v42 = vld [vmem:[%s2554_s3 + $0x18] ss:$28 sps:$4 sm:$0xff]   ;;  %p1919_p13 = pneg %p1918_p12 }
  0x33   : > { %1181 = vmatpush1.bf16.msra.mxu0 %v1760_v38  ;;  %1137 = vmatprep.subr.bf16.mxu1 %v1782_v43 }
  0x34   : > { %1182 = vmatprep.subr.bf16.mxu0 %v1768_v40  ;;  %p1926_p3 = pnand %p1925_p2, %p1919_p13 }
  0x36   : > { %1138 = vmatpush1.bf16.msra.mxu1 %v1787_v46 }
  0x37   : > { %1183 = vmatpush1.bf16.msra.mxu0 %v1766_v41  ;;  %1139 = vmatprep.subr.bf16.mxu1 %v1788_v48  ;;  %v1824_v41 = vld [vmem:[%s2554_s3 + $0x10] ss:$28 sps:$4 sm:$0xff]  }
  0x38   : > { %1184 = vmatprep.subr.bf16.mxu0 %v1774_v44  ;;  %v1831_v44 = vld [vmem:[%s2554_s3 + $0x4c] ss:$28 sps:$4 sm:$0xff]  }
  0x3a   : > { %1140 = vmatpush1.bf16.msra.mxu1 %v1793_v49 }
  0x3b   : > { %1185 = vmatpush1.bf16.msra.mxu0 %v1772_v45  ;;  %1141 = vmatprep.subr.bf16.mxu1 %v1794_v51  ;;  %v1832_v45 = vld [vmem:[%s2554_s3 + $0x210] ss:$28 sps:$4 sm:$0xff]   ;;  %v1829_v51 = vld [vmem:[%s2554_s3 + $0x48] ss:$28 sps:$4 sm:$0xff]  }
  0x3c   : > { %1186 = vmatprep.subr.bf16.mxu0 %v1780_v47 }
  0x3e   : > { %1142 = vmatpush1.bf16.msra.mxu1 %v1799_v53 }
  0x3f   : > { %1187 = vmatpush1.bf16.msra.mxu0 %v1778_v50  ;;  %1143 = vmatprep.subr.bf16.mxu1 %v1800_v55  ;;  %v1836_v55 = vld [vmem:[%s2554_s3 + $0x84] ss:$28 sps:$4 sm:$0xff]  }
  0x40   : > { %1188 = vmatprep.subr.bf16.mxu0 %v1786_v52  ;;  %v1833_v52 = vld [vmem:[%s2554_s3 + $0x50] ss:$28 sps:$4 sm:$0xff]  }
  0x42   : > { %1144 = vmatpush1.bf16.msra.mxu1 %v1805_v57 }
  0x43   : > { %1189 = vmatpush1.bf16.msra.mxu0 %v1784_v54  ;;  %1145 = vmatprep.subr.bf16.mxu1 %v1806_v59  ;;  %v1838_v59 = vld [vmem:[%s2554_s3 + $0x88] ss:$28 sps:$4 sm:$0xff]  }
  0x44   : > { %1190 = vmatprep.subr.bf16.mxu0 %v1792_v56  ;;  %v1837_v56 = vld [vmem:[%s2554_s3 + $0x248] ss:$28 sps:$4 sm:$0xff]  }
  0x46   : > { %1146 = vmatpush1.bf16.msra.mxu1 %v1811_v2  ;;  %v1844_v2 = vld [vmem:[%s2554_s3 + $0xf0] ss:$28 sps:$4 sm:$0xff]  }
  0x47   : > { %1191 = vmatpush1.bf16.msra.mxu0 %v1790_v58  ;;  %1147 = vmatprep.subr.bf16.mxu1 %v1812_v3  ;;  %v1834_v58 = vld [vmem:[%s2554_s3 + $0x80] ss:$28 sps:$4 sm:$0xff]   ;;  %v1848_v3 = vld [vmem:[%s2554_s3 + $0xf8] ss:$28 sps:$4 sm:$0xff]  }
  0x48   : > { %1192 = vmatprep.subr.bf16.mxu0 %v1798_v60  ;;  %v1841_v60 = vld [vmem:[%s2554_s3 + $0xbc] ss:$28 sps:$4 sm:$0xff]  }
  0x4a   : > { %1148 = vmatpush1.bf16.msra.mxu1 %v1817_v6  ;;  %v1849_v6 = vld [vmem:[%s2554_s3 + $0x128] ss:$28 sps:$4 sm:$0xff]  }
  0x4b   : > { %1193 = vmatpush1.bf16.msra.mxu0 %v1796_v61  ;;  %1149 = vmatprep.subr.bf16.mxu1 %v1818_v7  ;;  %v1842_v61 = vld [vmem:[%s2554_s3 + $0x280] ss:$28 sps:$4 sm:$0xff]   ;;  %v1853_v7 = vld [vmem:[%s2554_s3 + $0x130] ss:$28 sps:$4 sm:$0xff]  }
  0x4c   : > { %1194 = vmatprep.subr.bf16.mxu0 %v1804_v62  ;;  %v1839_v62 = vld [vmem:[%s2554_s3 + $0xb8] ss:$28 sps:$4 sm:$0xff]  }
  0x4e   : > { %1150 = vmatpush1.bf16.msra.mxu1 %v1823_v10  ;;  %v1854_v10 = vld [vmem:[%s2554_s3 + $0x160] ss:$28 sps:$4 sm:$0xff]  }
  0x4f   : > { %1195 = vmatpush1.bf16.msra.mxu0 %v1802_v63  ;;  %1221 = vmatprep.subr.bf16.mxu1 %v1826_v11  ;;  %v1843_v63 = vld [vmem:[%s2554_s3 + $0xc0] ss:$28 sps:$4 sm:$0xff]   ;;  %v1858_v11 = vld [vmem:[%s2554_s3 + $0x168] ss:$28 sps:$4 sm:$0xff]  }
  0x50   : > { %1196 = vmatprep.subr.bf16.mxu0 %v1810_v0  ;;  %v1846_v0 = vld [vmem:[%s2554_s3 + $0xf4] ss:$28 sps:$4 sm:$0xff]  }
  0x53   : > { %1197 = vmatpush1.bf16.msra.mxu0 %v1808_v1  ;;  %v1847_v1 = vld [vmem:[%s2554_s3 + $0x2b8] ss:$28 sps:$4 sm:$0xff]  }
  0x54   : > { %1198 = vmatprep.subr.bf16.mxu0 %v1816_v4  ;;  %v1851_v4 = vld [vmem:[%s2554_s3 + $0x12c] ss:$28 sps:$4 sm:$0xff]  }
  0x57   : > { %1199 = vmatpush1.bf16.msra.mxu0 %v1814_v5  ;;  %v1852_v5 = vld [vmem:[%s2554_s3 + $0x2f0] ss:$28 sps:$4 sm:$0xff]  }
  0x58   : > { %1200 = vmatprep.subr.bf16.mxu0 %v1822_v8  ;;  %v1856_v8 = vld [vmem:[%s2554_s3 + $0x164] ss:$28 sps:$4 sm:$0xff]  }
  0x5b   : > { %1201 = vmatpush1.bf16.msra.mxu0 %v1820_v9  ;;  %v1857_v9 = vld [vmem:[%s2554_s3 + $0x328] ss:$28 sps:$4 sm:$0xff]  }
  0x5c   : > { %1641 = vmatprep.subr.bf16.mxu0 %v1827_v12  ;;  %v1861_v12 = vld [vmem:[%s2554_s3 + $0x19c] ss:$28 sps:$4 sm:$0xff]  }
  0xf1   : > { %v339_v20 = vpop.f32.mrb[0].mxu0 }
  0xf2   : > { %v340_v21 = vadd.f32 %v339_v20, %v243_v18  ;;  %v341_v22 = vpop.f32.mrb[1].mxu0  ;;  %v1864_v20 = vld [vmem:[%s2554_s3 + $0x1d0] ss:$28 sps:$4 sm:$0xff]  }
  0xf3   : > { %v342_v23 = vadd.f32 %v341_v22, %v247_v19  ;;  %v343_v24 = vpop.f32.mrb[2].mxu0  ;;  %v1867_v22 = vld [vmem:[%s2554_s3 + $0x208] ss:$28 sps:$4 sm:$0xff]  }
  0xf4   : > { %v362_v25 = vmul.f32 0.01, %v340_v21  ;;  %v344_v26 = vadd.f32 %v343_v24, %v243_v18  ;;  %v345_v27 = vpop.f32.mrb[3].mxu0  ;;  %vm356_vm1 = vcmp.ge.f32.partialorder %v340_v21, 0.0  ;;  %v1870_v24 = vld [vmem:[%s2554_s3 + $0x240] ss:$28 sps:$4 sm:$0xff]  }
  0xf5   : > { %v363_v28 = vmul.f32 0.01, %v342_v23  ;;  %v346_v29 = vadd.f32 %v345_v27, %v247_v19  ;;  %vm357_vm2 = vcmp.ge.f32.partialorder %v342_v23, 0.0  ;;  %v1878_v27 = vld [vmem:[%s2554_s3 + $0x2b4] ss:$28 sps:$4 sm:$0xff]  }
  0xf6   : > { %vm358_vm3 = vcmp.ge.f32.partialorder %v344_v26, 0.0  ;;  %v364_v30 = vmul.f32 0.01, %v344_v26  ;;  %v368_v32 = vsel %vm356_vm1, %v340_v21, %v362_v25  ;;  %v1869_v21 = vld [vmem:[%s2554_s3 + $0x20c] ss:$28 sps:$4 sm:$0xff]  }
  0xf7   : > { %vm359_vm4 = vcmp.ge.f32.partialorder %v346_v29, 0.0  ;;  %v365_v31 = vmul.f32 0.01, %v346_v29  ;;  %v369_v34 = vsel %vm357_vm2, %v342_v23, %v363_v28  ;;  %v1872_v23 = vld [vmem:[%s2554_s3 + $0x244] ss:$28 sps:$4 sm:$0xff]  }
  0xf8   : > { %v370_v33 = vsel %vm358_vm3, %v344_v26, %v364_v30  ;;  %v1875_v25 = vld [vmem:[%s2554_s3 + $0x27c] ss:$28 sps:$4 sm:$0xff]   ;;  %v1876_v28 = vld [vmem:[%s2554_s3 + $0x2b0] ss:$28 sps:$4 sm:$0xff]   ;;  %v1879_v30 = vld [vmem:[%s2554_s3 + $0x2e8] ss:$28 sps:$4 sm:$0xff]  }
  0xf9   : > { %v2305_v35 = vpack.c.bf16 %v370_v33, %v368_v32  ;;  %v371_v36 = vsel %vm359_vm4, %v346_v29, %v365_v31  ;;  %v349_v37 = vpop.f32.mrb[4].mxu0  ;;  %v1873_v26 = vld [vmem:[%s2554_s3 + $0x278] ss:$28 sps:$4 sm:$0xff]   ;;  %v1881_v29 = vld [vmem:[%s2554_s3 + $0x2ec] ss:$28 sps:$4 sm:$0xff]  }
  0xfa   : > { %v375_v38 = vpack.c.bf16 %v371_v36, %v369_v34  ;;  %v350_v39 = vadd.f32 %v349_v37, %v243_v18  ;;  %v351_v40 = vpop.f32.mrb[5].mxu0  ;;  %v1863_v18 = vld [vmem:[%s2554_s3 + $0x1a0] ss:$28 sps:$4 sm:$0xff]   ;;  %v1885_v34 = vld [vmem:[%s2554_s3 + $0x358] ss:$28 sps:$4 sm:$0xff]   ;;  %v518_v36 = vsub.s32 2, %v2294_v14 }
  0xfb   : > { %v352_v43 = vadd.f32 %v351_v40, %v247_v19  ;;  %v353_v46 = vpop.f32.mrb[6].mxu0  ;;  %v1866_v19 = vld [vmem:[%s2554_s3 + $0x1d4] ss:$28 sps:$4 sm:$0xff]   ;;  %v1884_v31 = vld [vmem:[%s2554_s3 + $0x324] ss:$28 sps:$4 sm:$0xff]  }
  0xfc   : > { %vm360_vm5 = vcmp.ge.f32.partialorder %v350_v39, 0.0  ;;  %v366_v47 = vmul.f32 0.01, %v350_v39  ;;  %1151 = vmatprep.mubr.bf16.mxu1 %v375_v38  ;;  %1202 = vmatprep.mubr.bf16.mxu0 %v375_v38  ;;  %v354_v48 = vpop.f32.mrb[7].mxu0  ;;  %v1882_v32 = vld [vmem:[%s2554_s3 + $0x320] ss:$28 sps:$4 sm:$0xff]  }
  0xfd   : > { %vm361_vm6 = vcmp.ge.f32.partialorder %v352_v43, 0.0  ;;  %v367_v49 = vmul.f32 0.01, %v352_v43  ;;  %1152 = vmatmul.mubr.bf16.vlgmr.msra.gmra.mrb[0].mxu1 %v2305_v35  ;;  %1203 = vmatmul.mubr.bf16.vlgmr.msra.gmra.mrb[8].mxu0 %v2305_v35  ;;  %v1887_v33 = vld [vmem:[%s2554_s3 + $0x35c] ss:$28 sps:$4 sm:$0xff]  }
  0xfe   : > { %v372_v50 = vsel %vm360_vm5, %v350_v39, %v366_v47  ;;  %1222 = vmatpush1.bf16.msra.mxu1 %v1824_v41  ;;  %1642 = vmatpush3.bf16.msra.mxu0 %v1828_v42  ;;  %v2465_v37 = vld [vmem:[%s2555_s4] sm:$0x7f] }
  0xff   : > { %v373_v53 = vsel %vm361_vm6, %v352_v43, %v367_v49  ;;  %1223 = vmatprep.subr.bf16.mxu1 %v1831_v44  ;;  %1643 = vmatprep.subr.bf16.mxu0 %v1832_v45  ;;  %v2335_v57 = vpack.c.bf16 %v372_v50, %v372_v50  ;;  %v511_v39 = vrot.slane %v2465_v37, %v242_v15 }
 0x100   : > { %v2327_v54 = vpack.c.bf16 %v373_v53, %v373_v53  ;;  %v519_v40 = vrot.slane %v2465_v37, %v518_v36  ;;  %v515_v42 = vrot.slane %v2465_v37, %v246_v17 }
 0x102   : > { %1224 = vmatpush1.bf16.msra.mxu1 %v1829_v51  ;;  %1644 = vmatpush3.bf16.msra.mxu0 %v1833_v52 }
 0x103   : > { %1161 = vmatprep.mubr.bf16.mxu1 %v2327_v54  ;;  %1212 = vmatprep.mubr.bf16.mxu0 %v2327_v54 }
 0x104   : > { %1225 = vmatprep.subr.bf16.mxu1 %v1836_v55  ;;  %1645 = vmatprep.subr.bf16.mxu0 %v1837_v56 }
 0x105   : > { %1162 = vmatmul.mubr.bf16.gmra.mrb[4].mxu1 %v2335_v57  ;;  %1213 = vmatmul.mubr.bf16.gmra.mrb[12].mxu0 %v2335_v57 }
 0x106   : > { %1226 = vmatpush1.bf16.msra.mxu1 %v1834_v58  ;;  %1646 = vmatpush3.bf16.msra.mxu0 %v1838_v59 }
 0x107   : > { %1253 = vmatprep.mubr.bf16.mxu1 %v375_v38  ;;  %1304 = vmatprep.mubr.bf16.mxu0 %v375_v38  ;;  %v522_v38 = vsub.s32 3, %v2294_v14 }
 0x108   : > { %1227 = vmatprep.subr.bf16.mxu1 %v1841_v60  ;;  %1647 = vmatprep.subr.bf16.mxu0 %v1842_v61 }
 0x109   : > { %v523_v43 = vrot.slane %v2465_v37, %v522_v38 }
 0x10a   : > { %1228 = vmatpush1.bf16.msra.mxu1 %v1839_v62  ;;  %1648 = vmatpush3.bf16.msra.mxu0 %v1843_v63 }
 0x10b   : > { %1229 = vmatprep.subr.bf16.mxu1 %v1846_v0  ;;  %1649 = vmatprep.subr.bf16.mxu0 %v1847_v1 }
 0x10e   : > { %1230 = vmatpush1.bf16.msra.mxu1 %v1844_v2  ;;  %1650 = vmatpush3.bf16.msra.mxu0 %v1848_v3 }
 0x10f   : > { %1231 = vmatprep.subr.bf16.mxu1 %v1851_v4  ;;  %1651 = vmatprep.subr.bf16.mxu0 %v1852_v5 }
 0x112   : > { %1232 = vmatpush1.bf16.msra.mxu1 %v1849_v6  ;;  %1652 = vmatpush3.bf16.msra.mxu0 %v1853_v7 }
 0x113   : > { %1233 = vmatprep.subr.bf16.mxu1 %v1856_v8  ;;  %1653 = vmatprep.subr.bf16.mxu0 %v1857_v9 }
 0x116   : > { %1234 = vmatpush1.bf16.msra.mxu1 %v1854_v10  ;;  %1654 = vmatpush3.bf16.msra.mxu0 %v1858_v11 }
 0x117   : > { %1235 = vmatprep.subr.bf16.mxu1 %v1861_v12  ;;  %1655 = vmatprep.subr.bf16.mxu0 %v1862_v13 }
 0x11a   : > { %1236 = vmatpush1.bf16.msra.mxu1 %v1859_v16  ;;  %1656 = vmatpush3.bf16.msra.mxu0 %v1863_v18 }
 0x11b   : > { %1237 = vmatprep.subr.bf16.mxu1 %v1866_v19 }
 0x11d   : > { %1305 = vmatmul.mubr.bf16.vlgmr.msra.gmra.mrb[16].mxu0 %v2305_v35 }
 0x11e   : > { %1238 = vmatpush1.bf16.msra.mxu1 %v1864_v20  ;;  %1312 = vmatprep.mubr.bf16.mxu0 %v2327_v54 }
 0x11f   : > { %1239 = vmatprep.subr.bf16.mxu1 %v1869_v21 }
 0x122   : > { %1240 = vmatpush1.bf16.msra.mxu1 %v1867_v22 }
 0x123   : > { %1241 = vmatprep.subr.bf16.mxu1 %v1872_v23 }
 0x125   : > { %1313 = vmatmul.mubr.bf16.gmra.mrb[20].mxu0 %v2335_v57 }
 0x126   : > { %1242 = vmatpush1.bf16.msra.mxu1 %v1870_v24 }
 0x127   : > { %1243 = vmatprep.subr.bf16.mxu1 %v1875_v25 }
 0x12a   : > { %1244 = vmatpush1.bf16.msra.mxu1 %v1873_v26 }
 0x12b   : > { %1245 = vmatprep.subr.bf16.mxu1 %v1878_v27 }
 0x12e   : > { %1246 = vmatpush1.bf16.msra.mxu1 %v1876_v28 }
 0x12f   : > { %1247 = vmatprep.subr.bf16.mxu1 %v1881_v29  ;;  %v534_v29 = vsub.s32 6, %v2294_v14 }
 0x132   : > { %1248 = vmatpush1.bf16.msra.mxu1 %v1879_v30 }
 0x133   : > { %1249 = vmatprep.subr.bf16.mxu1 %v1884_v31 }
 0x136   : > { %1250 = vmatpush1.bf16.msra.mxu1 %v1882_v32  ;;  %v535_v32 = vrot.slane %v2465_v37, %v534_v29 }
 0x137   : > { %1251 = vmatprep.subr.bf16.mxu1 %v1887_v33 }
 0x13a   : > { %1252 = vmatpush1.bf16.msra.mxu1 %v1885_v34 }
 0x13d   : > { %1254 = vmatmul.mubr.bf16.vlgmr.msra.gmra.mrb[8].mxu1 %v2305_v35 }
 0x13e   : > { %1263 = vmatprep.mubr.bf16.mxu1 %v2327_v54 }
 0x145   : > { %1264 = vmatmul.mubr.bf16.gmra.mrb[12].mxu1 %v2335_v57 }
 0x1d0   : > { %v1153_v35 = vpop.f32.mrb[0].mxu1  ;;  %v1204_v41 = vpop.f32.mrb[8].mxu0 }
 0x1d1   : > { %v1155_v44 = vpop.f32.mrb[1].mxu1  ;;  %v1206_v45 = vpop.f32.mrb[9].mxu0  ;;  %v1154_v48 = vadd.f32 %v1153_v35, %v511_v39  ;;  %v1205_v49 = vadd.f32 %v1204_v41, %v519_v40 }
 0x1d2   : > { %v1157_v46 = vpop.f32.mrb[2].mxu1  ;;  %v1208_v47 = vpop.f32.mrb[10].mxu0  ;;  %v1156_v53 = vadd.f32 %v1155_v44, %v515_v42  ;;  %v1207_v54 = vadd.f32 %v1206_v45, %v523_v43 }
 0x1d3   : > { %v1158_v50 = vadd.f32 %v1157_v46, %v511_v39  ;;  %v1209_v51 = vadd.f32 %v1208_v47, %v519_v40  ;;  %v1159_v52 = vpop.f32.mrb[3].mxu1  ;;  %v1210_v15 = vpop.f32.mrb[11].mxu0 }
 0x1d4   : > { %v1160_v55 = vadd.f32 %v1159_v52, %v515_v42  ;;  %v1211_v56 = vadd.f32 %v1210_v15, %v523_v43  ;;  %v526_v52 = vsub.s32 4, %v2294_v14 }
 0x1d5   : > { %v1320_v57 = vpack.c.bf16 %v1158_v50, %v1154_v48  ;;  %v1322_v58 = vpack.c.bf16 %v1209_v51, %v1205_v49 }
 0x1d6   : > { %v1321_v59 = vpack.c.bf16 %v1160_v55, %v1156_v53  ;;  %v1323_v17 = vpack.c.bf16 %v1211_v56, %v1207_v54  ;;  %v530_v53 = vsub.s32 5, %v2294_v14  ;;  %v527_v54 = vrot.slane %v2465_v37, %v526_v52 }
 0x1d7   : > { %1888 = vtanh.bf16 %v1320_v57 }
 0x1d8   : > { %1890 = vtanh.bf16 %v1322_v58  ;;  %v1214_v60 = vpop.f32.mrb[12].mxu0  ;;  %v1163_v61 = vpop.f32.mrb[4].mxu1  ;;  %v531_v56 = vrot.slane %v2465_v37, %v530_v53 }
 0x1d9   : > { %1892 = vtanh.bf16 %v1321_v59  ;;  %v1215_v62 = vadd.f32 %v1214_v60, %v519_v40  ;;  %v1216_v63 = vpop.f32.mrb[13].mxu0  ;;  %v1164_v0 = vadd.f32 %v1163_v61, %v511_v39  ;;  %v1165_v1 = vpop.f32.mrb[5].mxu1 }
 0x1da   : > { %1894 = vtanh.bf16 %v1323_v17  ;;  %v1217_v2 = vadd.f32 %v1216_v63, %v523_v43  ;;  %v1218_v3 = vpop.f32.mrb[14].mxu0  ;;  %v1166_v4 = vadd.f32 %v1165_v1, %v515_v42  ;;  %v1167_v5 = vpop.f32.mrb[6].mxu1 }
 0x1db   : > { %v1329_v6 = vpack.c.bf16 %v1215_v62, %v1215_v62  ;;  %v1219_v7 = vpop.f32.mrb[15].mxu0  ;;  %v1327_v8 = vpack.c.bf16 %v1164_v0, %v1164_v0  ;;  %v1168_v9 = vpop.f32.mrb[7].mxu1 }
 0x1dc   : > { %v1330_v10 = vpack.c.bf16 %v1217_v2, %v1217_v2  ;;  %v1328_v11 = vpack.c.bf16 %v1166_v4, %v1166_v4 }
 0x1dd   : > { %1896 = vtanh.bf16 %v1329_v6 }
 0x1de   : > { %1898 = vtanh.bf16 %v1330_v10 }
 0x1df   : > { %1900 = vtanh.bf16 %v1327_v8 }
 0x1e0   : > { %1902 = vtanh.bf16 %v1328_v11 }
 0x1e2   : > { %v1889_v12 = vpop.eup %1888 }
 0x1e3   : > { %v1891_v13 = vpop.eup %1890 }
 0x1e4   : > { %v1893_v16 = vpop.eup %1892 }
 0x1e5   : > { %v1895_v18 = vpop.eup %1894  ;;  %v1626_v19 = vcombine.low %v1889_v12, %v1893_v16  ;;  %v1630_v20 = vcombine.high %v1889_v12, %v1893_v16 }
 0x1e6   : > { %v1627_v21 = vcombine.low %v1891_v13, %v1895_v18  ;;  %v1631_v22 = vcombine.high %v1891_v13, %v1895_v18 }
 0x1e7   : > { %1407 = vst [vmem:[%s2479_s17] sm:$0xff] %v1626_v19  ;;  %1412 = vst [vmem:[%s2479_s17 + $0x1c] sm:$0xff] %v1630_v20 }
 0x1e8   : > { %v1897_v23 = vpop.eup %1896  ;;  %1408 = vst [vmem:[%s2479_s17 + $0x8] sm:$0xff] %v1627_v21  ;;  %1413 = vst [vmem:[%s2479_s17 + $0x24] sm:$0xff] %v1631_v22 }
 0x1e9   : > { %v1899_v24 = vpop.eup %1898 }
 0x1ea   : > { %v1901_v25 = vpop.eup %1900  ;;  %v1635_v26 = vcombine.low %v1897_v23, %v1899_v24 }
 0x1eb   : > { %v1903_v27 = vpop.eup %1902 }
 0x1ec   : > { %1417 = vst [vmem:[%s2479_s17 + $0x40] sm:$0xff] %v1635_v26  ;;  %v1634_v28 = vcombine.low %v1901_v25, %v1903_v27 }
 0x1ee   : > { %1416 = vst [vmem:[%s2479_s17 + $0x38] sm:$0xff] %v1634_v28 }
 0x1f0   : > { %v1657_v30 = vpop.f32.mrb[16].mxu0 }
 0x1f1   : > { %v1658_v31 = vpop.f32.mrb[17].mxu0 }
 0x1f2   : > { %v1659_v33 = vadd.f32 %v1658_v31, %v1657_v30  ;;  %v1660_v34 = vpop.f32.mrb[18].mxu0 }
 0x1f3   : > { %v1661_v36 = vpop.f32.mrb[19].mxu0 }
 0x1f4   : > { %v1662_v38 = vadd.f32 %v1661_v36, %v1660_v34  ;;  %v1307_v39 = vadd.f32 %v1659_v33, %v535_v32 }
 0x1f6   : > { %v1310_v40 = vadd.f32 %v1662_v38, %v535_v32 }
 0x1f8   : > { %v1326_v35 = vpack.c.bf16 %v1310_v40, %v1307_v39  ;;  %v1663_v41 = vpop.f32.mrb[20].mxu0 }
 0x1f9   : > { %v1664_v42 = vpop.f32.mrb[21].mxu0 }
 0x1fa   : > { %1904 = vtanh.bf16 %v1326_v35  ;;  %v1665_v43 = vadd.f32 %v1664_v42, %v1663_v41  ;;  %v1666_v44 = vpop.f32.mrb[22].mxu0 }
 0x1fb   : > { %v1667_v45 = vpop.f32.mrb[23].mxu0 }
 0x1fc   : > { %v1315_v46 = vadd.f32 %v1665_v43, %v535_v32 }
 0x1fe   : > { %v1333_v47 = vpack.c.bf16 %v1315_v46, %v1315_v46 }
 0x200   : > { %1906 = vtanh.bf16 %v1333_v47 }
 0x205   : > { %v1905_v48 = vpop.eup %1904 }
 0x206   : > { %v1629_v49 = vcombine.low %v1905_v48, %v1905_v48  ;;  %v1633_v50 = vcombine.high %v1905_v48, %v1905_v48 }
 0x208   : > { %1411 = vst.msk [vmem:[%s2479_s17 + $0x18] sm:$0xf] %vm1410_vm7, %v1629_v49  ;;  %1415 = vst.msk [vmem:[%s2479_s17 + $0x34] sm:$0xf] %vm1410_vm7, %v1633_v50 }
 0x20b   : > { %v1907_v51 = vpop.eup %1906 }
 0x20c   : > { %v1637_v15 = vcombine.low %v1907_v51, %v1907_v51 }
 0x20e   : > { %1419 = vst.msk [vmem:[%s2479_s17 + $0x50] sm:$0xf] %vm1410_vm7, %v1637_v15 }
 0x210   : > { %v1255_v55 = vpop.f32.mrb[8].mxu1 }
 0x211   : > { %v1257_v57 = vpop.f32.mrb[9].mxu1  ;;  %v1256_v59 = vadd.f32 %v1255_v55, %v527_v54 }
 0x212   : > { %v1259_v58 = vpop.f32.mrb[10].mxu1  ;;  %v1258_v61 = vadd.f32 %v1257_v57, %v531_v56 }
 0x213   : > { %v1260_v17 = vadd.f32 %v1259_v58, %v527_v54  ;;  %v1261_v60 = vpop.f32.mrb[11].mxu1 }
 0x214   : > { %v1262_v62 = vadd.f32 %v1261_v60, %v531_v56 }
 0x215   : > { %v1324_v63 = vpack.c.bf16 %v1260_v17, %v1256_v59 }
 0x216   : > { %v1325_v0 = vpack.c.bf16 %v1262_v62, %v1258_v61 }
 0x217   : > { %1908 = vtanh.bf16 %v1324_v63 }
 0x218   : > { %1910 = vtanh.bf16 %v1325_v0  ;;  %v1265_v14 = vpop.f32.mrb[12].mxu1 }
 0x219   : > { %v1266_v1 = vadd.f32 %v1265_v14, %v527_v54  ;;  %v1267_v2 = vpop.f32.mrb[13].mxu1 }
 0x21a   : > { %v1268_v3 = vadd.f32 %v1267_v2, %v531_v56  ;;  %v1269_v37 = vpop.f32.mrb[14].mxu1 }
 0x21b   : > { %v1331_v4 = vpack.c.bf16 %v1266_v1, %v1266_v1  ;;  %v1270_v5 = vpop.f32.mrb[15].mxu1 }
 0x21c   : > { %v1332_v6 = vpack.c.bf16 %v1268_v3, %v1268_v3 }
 0x21d   : > { %1912 = vtanh.bf16 %v1331_v4 }
 0x21e   : > { %1914 = vtanh.bf16 %v1332_v6 }
 0x222   : > { %v1909_v7 = vpop.eup %1908 }
 0x223   : > { %v1911_v8 = vpop.eup %1910 }
 0x224   : > { %v1628_v9 = vcombine.low %v1909_v7, %v1911_v8  ;;  %v1632_v10 = vcombine.high %v1909_v7, %v1911_v8 }
 0x226   : > { %1409 = vst [vmem:[%s2479_s17 + $0x10] sm:$0xff] %v1628_v9  ;;  %1414 = vst [vmem:[%s2479_s17 + $0x2c] sm:$0xff] %v1632_v10 }
 0x228   : > { %v1913_v11 = vpop.eup %1912 }
 0x229   : > { %v1915_v12 = vpop.eup %1914 }
 0x22a   : > { %v1636_v13 = vcombine.low %v1913_v11, %v1915_v12 }
 0x22c   : > { %1418 = vst [vmem:[%s2479_s17 + $0x48] sm:$0xff] %v1636_v13 }
 0x22d   : > { %1929 = shalt.err (!%p1926_p3)
}
 0x22e   : > { %s1930_s12 = scalar_lea.hbm %s2503_s6, 1344  ;;  %s1934_s15 = scalar_lea.hbm %s2556_s5, 2688 }
 0x22f   : > { %p1931_p4 = scmp.ne.s32.totalorder %s2503_s6, %s1930_s12  ;;  %p1935_p9 = scmp.lt.u32.totalorder %s2503_s6, %s2556_s5 }
 0x230   : > { %p1936_p10 = scmp.lt.u32.totalorder %s1934_s15, %s1930_s12  ;;  %p1938_p12 = scmp.lt.u32.totalorder %s1930_s12, %s2503_s6 }
 0x231   : > { %p1932_p7 = pnand %p1931_p4, %p2052_p5 }
 0x232   : > { %p1937_p11 = por %p1936_p10, %p1935_p9 }
 0x233   : > { %p1933_p8 = pneg %p1932_p7 }
 0x234   : > { %p1939_p13 = por %p1938_p12, %p1937_p11 }
 0x236   : > { %p1940_p0 = pnand %p1939_p13, %p1933_p8 }
 0x238   : > { %1943 = shalt.err (!%p1940_p0)
}
 0x239   : > { %s1982_s17 = smov 448   ;;  %s1983_s23 = smov 28  }
 0x23a   : > { %1671 = dma.vmem_to_hbm [thread:$0]  (%p2052_p5), %s2505_s25, 1344, %s2503_s6, %s2510_s9, %s1982_s17, %s1982_s17, %s1983_s23  }
 0x23b PF: > { %p1678_p1 = scmp.ge.s32.totalorder %s1978_s21, 2  ;;  %s1450_s26 = sand.u32 1, %s1966_s18  }
 0x23c   : > { %s1451_s30 = scalar_lea.sflag [#allocation3], %s1450_s26 }
 0x23d   : > { %p1674_p2 = pnand %p1678_p1, %p2056_p6 }
 0x23f   : > { %1961 = dma.done.wait (!%p1674_p2), %s1451_s30, 1344  }
 0x240   : > { %1963 = vsyncadd (!%p1674_p2), %s1451_s30, 4294965952  ;;  %p15_p3 = scmp.ge.s32.totalorder %s2039_s24, 4   ;;  %s2559_s18 = smov %s1970_s19 }
 0x241   : > { %s2560_s19 = smov %s1974_s20  ;;  %s2561_s20 = smov %s2050_s27 }
 0x242   : > { %s2562_s21 = smov %s2039_s24  ;;  %17 = sbr.rel (!%p15_p3) target bundleno = 3 (0x3), region = 75 }
 0x249   :  { %1456 = vsyncpa [#allocation3], 1 }
 0x24a   :  { %1458 = vsyncpa [#allocation3 + $0x1], 1 }

</bundles_post_ra>
